<compile_context>
chip_gen: v5e
topology: v5e:2x2
jax: 0.10.0
libtpu: 0.0.40
codegen_flags: <defaults>
</compile_context>

<pallas_src>
import jax
import jax.numpy as jnp
from jax.experimental import pallas as pl
from jax.experimental.pallas import tpu as pltpu


OUT_PAD = 128  # lane-dense padded width of the final layer (true logits = first 10)
D_IN = 28 * 28


def mlp_kernel(x_ref, w1_ref, b1_ref, w2_ref, b2_ref, w3_ref, b3_ref, o_ref):
    # x arrives in its HBM dtype (f32); cast to bf16 in-kernel so the HBM x
    # stream is a single f32 read (no separate wrapper cast pass).
    x = x_ref[...].astype(w1_ref.dtype)
    # Layer 1: Linear(784 -> 256) + ReLU  (bf16 MXU, f32 accumulation/epilogue)
    h1 = jnp.dot(x, w1_ref[...], preferred_element_type=jnp.float32)
    h1 = jnp.maximum(h1 + b1_ref[...], 0.0)
    # Layer 2: Linear(256 -> 128) + ReLU
    h2 = jnp.dot(h1.astype(w2_ref.dtype), w2_ref[...],
                 preferred_element_type=jnp.float32)
    h2 = jnp.maximum(h2 + b2_ref[...], 0.0)
    # Layer 3: Linear(128 -> 10), zero-padded to 128 output lanes
    out = jnp.dot(h2.astype(w3_ref.dtype), w3_ref[...],
                  preferred_element_type=jnp.float32)
    o_ref[...] = (out + b3_ref[...]).astype(o_ref.dtype)


def _round_up(a, m):
    return ((a + m - 1) // m) * m


def mlp_forward(x_nchw, params, *, batch_tile=2048,
                compute_dtype=jnp.bfloat16, out_dtype=jnp.bfloat16):
    """x_nchw: (N, 1, 28, 28) float32.  Returns logits (N, 10) in float32."""
    w1, b1, w2, b2, w3, b3 = params
    n = x_nchw.shape[0]

    # nn.Flatten() (row-major, matches PyTorch).  Keep source dtype -> no extra
    # HBM pass; the bf16 cast happens inside the kernel.
    x = x_nchw.reshape(n, D_IN)

    # ---- batch tiling -------------------------------------------------------
    # multiple of 16 (bf16 output sublane packing); cap at ~n/2 so the grid has
    # at least 2 steps (feeds both v7x TensorCores via the parallel axis).
    tb = max(16, min(_round_up(batch_tile, 16), _round_up(pl.cdiv(n, 2), 16)))
    n_rows = n
    if n < tb:
        # micro-batch only: pad up to one full tile (tiny copy, few rows)
        x = jnp.pad(x, ((0, tb - n), (0, 0)))
        n_rows = tb
    grid = (pl.cdiv(n_rows, tb),)   # ragged tail handled by Pallas partial block

    # ---- weights: bf16 for the MXU; last layer zero-padded to 128 lanes -----
    w1c = w1.astype(compute_dtype)
    w2c = w2.astype(compute_dtype)
    w3c = jnp.zeros((w3.shape[0], OUT_PAD), compute_dtype).at[:, :10].set(
        w3.astype(compute_dtype))
    # biases stay f32 (f32 epilogue), shaped (1, F) for 2-D broadcasting.
    b1_2d = b1.astype(jnp.float32).reshape(1, -1)
    b2_2d = b2.astype(jnp.float32).reshape(1, -1)
    b3_2d = jnp.zeros((1, OUT_PAD), jnp.float32).at[:, :10].set(
        b3.astype(jnp.float32).reshape(1, -1))

    # Weights/biases: full block, constant index map -> VMEM-resident.
    full = lambda shape: pl.BlockSpec(shape, lambda i: tuple(0 for _ in shape))

    # ---- VMEM budget (sized from the real tile footprint) -------------------
    xb = jnp.dtype(x.dtype).itemsize          # f32 streamed x
    ob = jnp.dtype(out_dtype).itemsize        # bf16 output
    wb = jnp.dtype(compute_dtype).itemsize    # bf16 weights
    w_bytes = (D_IN * 256 + 256 * 128 + 128 * OUT_PAD) * wb
    b_bytes = (256 + 128 + OUT_PAD) * 4
    est = (2 * tb * D_IN * xb                 # x double-buffer (f32)
           + tb * D_IN * 2                    # in-kernel bf16 copy of the x tile
           + 2 * tb * OUT_PAD * ob            # output double-buffer (bf16)
           + 2 * (w_bytes + b_bytes)          # resident weights/biases (2x slack)
           + tb * (256 + 128 + OUT_PAD) * 4)  # f32 h1/h2/out temporaries
    # the computed estimate (not the cap) is the real guard on v7x's 64 MiB
    vmem_limit = int(min(max(32 << 20, int(1.5 * est)), 56 << 20))

    out = pl.pallas_call(
        mlp_kernel,
        out_shape=jax.ShapeDtypeStruct((n_rows, OUT_PAD), out_dtype),
        grid_spec=pltpu.PrefetchScalarGridSpec(
            num_scalar_prefetch=0,
            grid=grid,
            in_specs=[
                pl.BlockSpec((tb, D_IN), lambda i: (i, 0)),   # streamed x tile
                full(w1c.shape),
                full(b1_2d.shape),
                full(w2c.shape),
                full(b2_2d.shape),
                full(w3c.shape),
                full(b3_2d.shape),
            ],
            out_specs=pl.BlockSpec((tb, OUT_PAD), lambda i: (i, 0)),
        ),
        compiler_params=pltpu.CompilerParams(
            dimension_semantics=("parallel",),
            vmem_limit_bytes=vmem_limit,
        ),
    )(x, w1c, b1_2d, w2c, b2_2d, w3c, b3_2d)

    # strip batch tail and the lane padding of the last layer; present f32 logits
    return out[:n, :10].astype(jnp.float32)


def init_params(key):
    """Deterministic init mirroring nn.Linear default: U(-1/sqrt(fan_in), ...)."""
    dims = [(D_IN, 256), (256, 128), (128, 10)]
    params = []
    keys = jax.random.split(key, 2 * len(dims))
    for i, (fan_in, fan_out) in enumerate(dims):
        bound = 1.0 / (fan_in ** 0.5)
        w = jax.random.uniform(keys[2 * i], (fan_in, fan_out),
                               minval=-bound, maxval=bound, dtype=jnp.float32)
        b = jax.random.uniform(keys[2 * i + 1], (fan_out,),
                               minval=-bound, maxval=bound, dtype=jnp.float32)
        params += [w, b]
    return tuple(params)


if __name__ == "__main__":
    key = jax.random.PRNGKey(0)
    pkey, xkey = jax.random.split(key)
    params = init_params(pkey)

    # Small MNIST-like batch: (N, C, H, W) = (32, 1, 28, 28)
    # (32 rows -> tb=16, grid=(2,): exercises the multi-step pipeline / megacore path)
    x = jax.random.normal(xkey, (32, 1, 28, 28), dtype=jnp.float32)

    logits = mlp_forward(x, params)
    logits = jax.block_until_ready(logits)

    # Reference in plain JAX with matching bf16 inputs / f32 accumulation.
    w1, b1, w2, b2, w3, b3 = params
    xf = x.reshape(x.shape[0], -1).astype(jnp.bfloat16)
    h1 = jnp.maximum(
        jnp.dot(xf, w1.astype(jnp.bfloat16), preferred_element_type=jnp.float32) + b1, 0.0)
    h2 = jnp.maximum(
        jnp.dot(h1.astype(jnp.bfloat16), w2.astype(jnp.bfloat16),
                preferred_element_type=jnp.float32) + b2, 0.0)
    ref = jnp.dot(h2.astype(jnp.bfloat16), w3.astype(jnp.bfloat16),
                  preferred_element_type=jnp.float32) + b3

    assert logits.shape == (32, 10), logits.shape
    assert jnp.allclose(logits, ref, atol=2e-2, rtol=2e-2), (
        float(jnp.max(jnp.abs(logits - ref))))

    print("KERNEL_OK")
</pallas_src>

<mosaic_0001>
module attributes {stable_mosaic.version = 11 : i64} {
  func.func @mlp_kernel(%arg0: i32, %arg1: memref<16x784xf32, #tpu.memory_space<vmem>>, %arg2: memref<784x256xbf16, #tpu.memory_space<vmem>>, %arg3: memref<1x256xf32, #tpu.memory_space<vmem>>, %arg4: memref<256x128xbf16, #tpu.memory_space<vmem>>, %arg5: memref<1x128xf32, #tpu.memory_space<vmem>>, %arg6: memref<128x128xbf16, #tpu.memory_space<vmem>>, %arg7: memref<1x128xf32, #tpu.memory_space<vmem>>, %arg8: memref<16x128xbf16, #tpu.memory_space<vmem>>) attributes {dimension_semantics = [#tpu.dimension_semantics<parallel>], iteration_bounds = array<i64: 2>, scalar_prefetch = 0 : i64, scratch_operands = 0 : i64, tpu.core_type = #tpu.core_type<tc>, window_params = [{transform_indices = @transform_0, window_bounds = array<i64: 16, 784>}, {pipeline_mode = #tpu.pipeline_mode<synchronous>, transform_indices = @transform_1, window_bounds = array<i64: 784, 256>}, {pipeline_mode = #tpu.pipeline_mode<synchronous>, transform_indices = @transform_2, window_bounds = array<i64: 1, 256>}, {pipeline_mode = #tpu.pipeline_mode<synchronous>, transform_indices = @transform_3, window_bounds = array<i64: 256, 128>}, {pipeline_mode = #tpu.pipeline_mode<synchronous>, transform_indices = @transform_4, window_bounds = array<i64: 1, 128>}, {pipeline_mode = #tpu.pipeline_mode<synchronous>, transform_indices = @transform_5, window_bounds = array<i64: 128, 128>}, {pipeline_mode = #tpu.pipeline_mode<synchronous>, transform_indices = @transform_6, window_bounds = array<i64: 1, 128>}, {transform_indices = @transform_7, window_bounds = array<i64: 16, 128>}]} {
    %c0 = arith.constant 0 : index
    %c0_0 = arith.constant 0 : index
    %0 = vector.load %arg1[%c0, %c0_0] : memref<16x784xf32, #tpu.memory_space<vmem>>, vector<16x784xf32>
    %1 = arith.truncf %0 : vector<16x784xf32> to vector<16x784xbf16>
    %c0_1 = arith.constant 0 : index
    %c0_2 = arith.constant 0 : index
    %2 = vector.load %arg2[%c0_1, %c0_2] : memref<784x256xbf16, #tpu.memory_space<vmem>>, vector<784x256xbf16>
    %cst = arith.constant dense<0.000000e+00> : vector<16x256xf32>
    %3 = tpu.matmul %1, %2, %cst {dimension_numbers = #tpu.dot_dimension_numbers<[1], [0], [0], [1], [0, 0, 1, 1], [], []>} : vector<16x784xbf16>, vector<784x256xbf16>, vector<16x256xf32> -> vector<16x256xf32>
    %c0_3 = arith.constant 0 : index
    %c0_4 = arith.constant 0 : index
    %4 = vector.load %arg3[%c0_3, %c0_4] : memref<1x256xf32, #tpu.memory_space<vmem>>, vector<1x256xf32>
    %5 = vector.broadcast %4 : vector<1x256xf32> to vector<16x256xf32>
    %6 = arith.addf %3, %5 : vector<16x256xf32>
    %cst_5 = arith.constant 0.000000e+00 : f32
    %7 = vector.broadcast %cst_5 : f32 to vector<16x256xf32>
    %8 = arith.maximumf %6, %7 : vector<16x256xf32>
    %9 = arith.truncf %8 : vector<16x256xf32> to vector<16x256xbf16>
    %c0_6 = arith.constant 0 : index
    %c0_7 = arith.constant 0 : index
    %10 = vector.load %arg4[%c0_6, %c0_7] : memref<256x128xbf16, #tpu.memory_space<vmem>>, vector<256x128xbf16>
    %cst_8 = arith.constant dense<0.000000e+00> : vector<16x128xf32>
    %11 = tpu.matmul %9, %10, %cst_8 {dimension_numbers = #tpu.dot_dimension_numbers<[1], [0], [0], [1], [0, 0, 1, 1], [], []>} : vector<16x256xbf16>, vector<256x128xbf16>, vector<16x128xf32> -> vector<16x128xf32>
    %c0_9 = arith.constant 0 : index
    %c0_10 = arith.constant 0 : index
    %12 = vector.load %arg5[%c0_9, %c0_10] : memref<1x128xf32, #tpu.memory_space<vmem>>, vector<1x128xf32>
    %13 = vector.broadcast %12 : vector<1x128xf32> to vector<16x128xf32>
    %14 = arith.addf %11, %13 : vector<16x128xf32>
    %cst_11 = arith.constant 0.000000e+00 : f32
    %15 = vector.broadcast %cst_11 : f32 to vector<16x128xf32>
    %16 = arith.maximumf %14, %15 : vector<16x128xf32>
    %17 = arith.truncf %16 : vector<16x128xf32> to vector<16x128xbf16>
    %c0_12 = arith.constant 0 : index
    %c0_13 = arith.constant 0 : index
    %18 = vector.load %arg6[%c0_12, %c0_13] : memref<128x128xbf16, #tpu.memory_space<vmem>>, vector<128x128xbf16>
    %cst_14 = arith.constant dense<0.000000e+00> : vector<16x128xf32>
    %19 = tpu.matmul %17, %18, %cst_14 {dimension_numbers = #tpu.dot_dimension_numbers<[1], [0], [0], [1], [0, 0, 1, 1], [], []>} : vector<16x128xbf16>, vector<128x128xbf16>, vector<16x128xf32> -> vector<16x128xf32>
    %c0_15 = arith.constant 0 : index
    %c0_16 = arith.constant 0 : index
    %20 = vector.load %arg7[%c0_15, %c0_16] : memref<1x128xf32, #tpu.memory_space<vmem>>, vector<1x128xf32>
    %21 = vector.broadcast %20 : vector<1x128xf32> to vector<16x128xf32>
    %22 = arith.addf %19, %21 : vector<16x128xf32>
    %23 = arith.truncf %22 : vector<16x128xf32> to vector<16x128xbf16>
    %c0_17 = arith.constant 0 : index
    %c0_18 = arith.constant 0 : index
    %24 = vector.load %arg8[%c0_17, %c0_18] : memref<16x128xbf16, #tpu.memory_space<vmem>>, vector<16x128xbf16>
    tpu.vector_store %arg8[%c0_17, %c0_18], %23 {strides = array<i32>} : memref<16x128xbf16, #tpu.memory_space<vmem>>, vector<16x128xbf16>,
    return
  }
  func.func @transform_0(%arg0: i32) -> (i32, i32) {
    %c0_i32 = arith.constant 0 : i32
    %c0_i32_0 = arith.constant 0 : i32
    return %arg0, %c0_i32 : i32, i32
  }
  func.func @transform_1(%arg0: i32) -> (i32, i32) {
    %c0_i32 = arith.constant 0 : i32
    %c0_i32_0 = arith.constant 0 : i32
    %c0_i32_1 = arith.constant 0 : i32
    return %c0_i32, %c0_i32_0 : i32, i32
  }
  func.func @transform_2(%arg0: i32) -> (i32, i32) {
    %c0_i32 = arith.constant 0 : i32
    %c0_i32_0 = arith.constant 0 : i32
    %c0_i32_1 = arith.constant 0 : i32
    return %c0_i32, %c0_i32_0 : i32, i32
  }
  func.func @transform_3(%arg0: i32) -> (i32, i32) {
    %c0_i32 = arith.constant 0 : i32
    %c0_i32_0 = arith.constant 0 : i32
    %c0_i32_1 = arith.constant 0 : i32
    return %c0_i32, %c0_i32_0 : i32, i32
  }
  func.func @transform_4(%arg0: i32) -> (i32, i32) {
    %c0_i32 = arith.constant 0 : i32
    %c0_i32_0 = arith.constant 0 : i32
    %c0_i32_1 = arith.constant 0 : i32
    return %c0_i32, %c0_i32_0 : i32, i32
  }
  func.func @transform_5(%arg0: i32) -> (i32, i32) {
    %c0_i32 = arith.constant 0 : i32
    %c0_i32_0 = arith.constant 0 : i32
    %c0_i32_1 = arith.constant 0 : i32
    return %c0_i32, %c0_i32_0 : i32, i32
  }
  func.func @transform_6(%arg0: i32) -> (i32, i32) {
    %c0_i32 = arith.constant 0 : i32
    %c0_i32_0 = arith.constant 0 : i32
    %c0_i32_1 = arith.constant 0 : i32
    return %c0_i32, %c0_i32_0 : i32, i32
  }
  func.func @transform_7(%arg0: i32) -> (i32, i32) {
    %c0_i32 = arith.constant 0 : i32
    %c0_i32_0 = arith.constant 0 : i32
    return %arg0, %c0_i32 : i32, i32
  }
}

</mosaic_0001>

<bundles_post_ra>
// kernel: tpu_custom_call.1
= control target key start
LH: loop header
LB: loop body
LE: loop exit
PB: predicated region body
PF: predicated region fallthrough
CT: control target
= control target key end

     0   :  { %s2801_s0 = inlined_call_operand.hbm [shape: f32[32,784], index: 0, kind: input, shape index: {}]   ;;  %s2802_s1 = inlined_call_operand.hbm [shape: bf16[784,256], index: 1, kind: input, shape index: {}]   ;;  %s2803_s2 = inlined_call_operand.hbm [shape: f32[1,256], index: 2, kind: input, shape index: {}]   ;;  %s2804_s3 = inlined_call_operand.hbm [shape: bf16[256,128], index: 3, kind: input, shape index: {}]   ;;  %s2805_s4 = inlined_call_operand.vmem [shape: f32[1,128], index: 4, kind: input, shape index: {}]   ;;  %s2806_s5 = inlined_call_operand.hbm [shape: bf16[128,128], index: 5, kind: input, shape index: {}]   ;;  %s2807_s6 = inlined_call_operand.vmem [shape: f32[1,128], index: 6, kind: input, shape index: {}]   ;;  %s2808_s7 = inlined_call_operand.hbm [shape: bf16[32,128], index: 7, kind: output, shape index: {}]  }
   0x1   :  { %2809 = sst [smem:[#allocation16_spill]] %s2802_s1 }
   0x2   :  { %2810 = sst [smem:[#allocation17_spill]] %s2803_s2 }
   0x3   :  { %2811 = sst [smem:[#allocation18_spill]] %s2804_s3 }
   0x4   :  { %12 = vsyncpa [#allocation3], 0 }
   0x5   :  { %14 = vsyncpa [#allocation3 + $0x1], 0 }
   0x6   :  { %15 = vsyncpa [#allocation6], 0 }
   0x7   :  { %16 = vsyncpa [#allocation9], 0 }
   0x8   :  { %17 = vsyncpa [#allocation4], 0 }
   0x9   :  { %19 = vsyncpa [#allocation4 + $0x1], 0  ;;  %s2581_s24 = smov 0   ;;  %s2583_s25 = smov 0  }
   0xa   :  { %s2585_s26 = smov 0   ;;  %s2587_s27 = smov 0  }
   0xb LB: > { %s2602_s28 = sadd.s32 4294967295, %s2527_s27   ;;  %s1564_s29 = sadd.s32 4294967294, %s2527_s27   ;;  %s2527_s27 = sphi %s2587_s27, %s2825_s27   ;;  %s2523_s26 = sphi %s2585_s26, %s2824_s26   ;;  %s2519_s25 = sphi %s2583_s25, %s2823_s25   ;;  %s2515_s24 = sphi %s2581_s24, %s2822_s24  }
   0xc   : > { %p45_p0 = scmp.ne.s32.totalorder %s2519_s25, %s2515_s24  ;;  %p46_p1 = scmp.eq.s32.totalorder %s2602_s28, 0 }
   0xd   : > { %p195_p2 = scmp.eq.s32.totalorder %s2602_s28, 1  ;;  %p201_p3 = scmp.eq.s32.totalorder %s1564_s29, 1 }
   0xe   : > { %p2611_p4 = por %p46_p1, %p45_p0  ;;  %p1565_p5 = scmp.ge.s32.totalorder %s2527_s27, 1 }
   0xf   : > { %p2616_p6 = por %p201_p3, %p45_p0  ;;  %p208_p7 = scmp.lt.s32.totalorder %s2527_s27, 3 }
  0x10   : > { %s2814_s1 = sld [smem:[#allocation16_spill]]  ;;  %s2529_s13 = smov [#allocation5]  }
  0x11   : > { %p2624_p8 = pnand %p1565_p5, %p208_p7  ;;  %s221_s14 = sshll.u32 %s2529_s13, 4  ;;  %s222_s14 = int_to_ptr.vmem [resolvable:$true] %s221_s14 }
  0x12   : > { %s2817_s3 = sld [smem:[#allocation18_spill]]  ;;  %s2530_s19 = smov 128  }
  0x13   : > { %p2226_p9 = pneg %p2624_p8  ;;  %s2531_s20 = smov 8  }
  0x14   : > { %s2532_s21 = smov [#allocation8]   ;;  %s2533_s23 = smov 64  }
  0x15   : > { %p2632_p10 = pnand %p2226_p9, %p46_p1  ;;  %s247_s22 = sshll.u32 %s2532_s21, 4  ;;  %s248_s22 = int_to_ptr.vmem [resolvable:$true] %s247_s22 }
  0x16   : > { %s219_s11 = sshll.u32 %s2814_s1, 4  ;;  %s2534_s29 = smov 4   ;;  %s220_s11 = int_to_ptr.hbm [resolvable:$true] %s219_s11 }
  0x17   : > { %2229 = dma.hbm_to_vmem [thread:$0]  (!%p2632_p10), %s220_s11, 12544, %s222_s14, [#allocation6], %s2530_s19, %s2530_s19, %s2531_s20  }
  0x18   : > { %s245_s18 = sshll.u32 %s2817_s3, 4  ;;  %s2818_s2 = sld [smem:[#allocation17_spill]]  ;;  %s246_s18 = int_to_ptr.hbm [resolvable:$true] %s245_s18 }
  0x19   : > { %2235 = dma.hbm_to_vmem [thread:$0]  (!%p2632_p10), %s246_s18, 2048, %s248_s22, [#allocation9], %s2533_s23, %s2533_s23, %s2534_s29  }
  0x1a   : > { %s2535_s11 = smov [#allocation7]   ;;  %s262_s19 = sshll.u32 %s2806_s5, 4  ;;  %s263_s19 = int_to_ptr.hbm [resolvable:$true] %s262_s19 }
  0x1b   : > { %s236_s14 = sshll.u32 %s2535_s11, 4  ;;  %s2536_s18 = smov [#allocation10]   ;;  %s237_s14 = int_to_ptr.vmem [resolvable:$true] %s236_s14 }
  0x1c   : > { %s264_s20 = sshll.u32 %s2536_s18, 4  ;;  %s2655_s21 = sadd.s32 1, %s2527_s27   ;;  %s265_s20 = int_to_ptr.vmem [resolvable:$true] %s264_s20 }
  0x1d   : > { %2238 = dma.hbm_to_vmem [thread:$0]  (!%p2632_p10), %s263_s19, 1024, %s265_s20, [#allocation9], %s2533_s23, %s2533_s23, %s2534_s29  }
  0x1e   : > { %s234_s13 = sshll.u32 %s2818_s2, 4  ;;  %s32_s22 = sadd.s32 1, %s2523_s26  ;;  %s235_s13 = int_to_ptr.hbm [resolvable:$true] %s234_s13 }
  0x1f   : > { %2232 = dma.hbm_to_vmem [thread:$0]  (!%p2632_p10), %s235_s13, 32, %s237_s14, [#allocation6]  }
  0x20   : > { %s29_s9 = ssub.s32 %s2527_s27, %s2655_s21  ;;  %p39_p12 = scmp.ne.s32.totalorder %s2523_s26, %s2519_s25 }
  0x21   : > { %p30_p13 = scmp.eq.s32.totalorder %s29_s9, 0  ;;  %p40_p0 = scmp.eq.s32.totalorder %s2527_s27, 0 }
  0x22   : > { %p2665_p3 = por %p195_p2, %p39_p12  ;;  %p2251_p5 = scmp.lt.s32.totalorder %s2527_s27, 2 }
  0x23   : > { %s2671_s13 = scalar_select %p30_p13, %s2523_s26, %s32_s22  }
  0x24   : > { %p41_p7 = por %p40_p0, %p39_p12  ;;  %s281_s11 = sand.u32 1, %s2523_s26  }
  0x25   : > { %s2203_s15 = smul.u32 112, %s281_s11  ;;  %s282_s22 = scalar_lea.sflag [#allocation3], %s281_s11 }
  0x26   : > { %s2204_s23 = smul.u32 112, %s2527_s27  ;;  %p2675_p9 = pnand %p2251_p5, %p41_p7 }
  0x27   : > { %s285_s19 = scalar_lea.vmem [#allocation2], %s2203_s15  ;;  %s2430_s14 = scalar_lea.hbm %s2801_s0, 224 }
  0x28   : > { %s291_s17 = scalar_lea.hbm %s2801_s0, %s2204_s23  ;;  %s294_s18 = sshll.u32 %s285_s19, 4  ;;  %s295_s18 = int_to_ptr.vmem [resolvable:$true] %s294_s18 }
  0x29   : > { %s292_s20 = sshll.u32 %s291_s17, 4  ;;  %p2427_p10 = pneg %p2675_p9  ;;  %s293_s20 = int_to_ptr.hbm [resolvable:$true] %s292_s20 }
  0x2a   : > { %s2423_s9 = sshra.s32 %s293_s20, 4  ;;  %s2424_s9 = int_to_ptr.hbm [resolvable:$true] %s2423_s9 }
  0x2b   : > { %s2425_s1 = scalar_lea.hbm %s2424_s9, 112  ;;  %p2431_p0 = scmp.lt.s32.totalorder %s2424_s9, %s2801_s0 }
  0x2c   : > { %p2426_p2 = scmp.ne.s32.totalorder %s2424_s9, %s2425_s1  ;;  %p2432_p5 = scmp.lt.s32.totalorder %s2430_s14, %s2425_s1 }
  0x2e   : > { %p2428_p12 = pnand %p2427_p10, %p2426_p2  ;;  %p2433_p7 = por %p2432_p5, %p2431_p0 }
  0x30   : > { %p2429_p13 = pneg %p2428_p12 }
  0x32   : > { %p2434_p11 = pnand %p2433_p7, %p2429_p13 }
  0x34   : > { %2437 = shalt.err (!%p2434_p11)
}
  0x35   : > { %s2537_s11 = smov 896   ;;  %s2538_s15 = smov 56  }
  0x36   : > { %2242 = dma.hbm_to_vmem [thread:$0]  (!%p2675_p9), %s293_s20, 1792, %s295_s18, %s282_s22, %s2537_s11, %s2537_s11, %s2538_s15  }
  0x37   : > { %306 = sbr.rel (%p2624_p8) target bundleno = 618 (0x26a), region = 48  ;;  %s2695_s2 = sand.u32 (!%p2624_p8), 1, %s2519_s25  }
  0x38   : > { %s2205_s3 = smul.u32 (!%p2624_p8), 112, %s2695_s2  ;;  %s309_s17 = scalar_lea.sflag (!%p2624_p8), [#allocation3], %s2695_s2 }
  0x3a   : > { %s2699_s1 = scalar_lea.vmem (!%p2624_p8), [#allocation2], %s2205_s3 }
  0x3c   : > { %2498 = dma.done.wait (%p2611_p4), %s309_s17, 1792  }
  0x3d   : > { %2500 = vsyncadd (%p2611_p4), %s309_s17, 4294965504 }
  0x3e   : > { %2502 = dma.done.wait (%p46_p1), [#allocation6], 12576  }
  0x3f   : > { %2504 = vsyncadd (%p46_p1), [#allocation6], 4294954720 }
  0x40   : > { %2506 = dma.done.wait (%p46_p1), [#allocation9], 3072  }
  0x41   : > { %2508 = vsyncadd (%p46_p1), [#allocation9], 4294964224  ;;  %v1638_v0 = vld [vmem:[#allocation5 + $0x70] sm:$0xf]  ;;  %v2090_v1 = vld [vmem:[#allocation5 + $0x74] sm:$0xf0] }
  0x42   : > { %v1766_v2 = vld [vmem:[#allocation5 + $0x170] sm:$0xf]  ;;  %v1639_v3 = vor.u32 %v2090_v1, %v1638_v0  ;;  %v2122_v4 = vld [vmem:[#allocation5 + $0x174] sm:$0xf0]  ;;  %v1630_v11 = vld [vmem:[#allocation5 + $0x60] sm:$0xf] }
  0x43   : > { %v1830_v5 = vld [vmem:[#allocation5 + $0x1f0] sm:$0xf]  ;;  %v2138_v6 = vld [vmem:[#allocation5 + $0x1f4] sm:$0xf0]  ;;  %v1767_v7 = vor.u32 %v2122_v4, %v1766_v2  ;;  %v2088_v13 = vld [vmem:[#allocation5 + $0x64] sm:$0xf0] }
  0x44   : > { %v1831_v8 = vor.u32 %v2138_v6, %v1830_v5  ;;  %v1702_v9 = vld [vmem:[#allocation5 + $0xf0] sm:$0xf]  ;;  %v2106_v10 = vld [vmem:[#allocation5 + $0xf4] sm:$0xf0]  ;;  %986 = vmatpush.bf16.msra.mxu0 %v1639_v3  ;;  %v1758_v14 = vld [vmem:[#allocation5 + $0x160] sm:$0xf]  ;;  %v1631_v16 = vor.u32 %v2088_v13, %v1630_v11 }
  0x45   : > { %v1703_v12 = vor.u32 %v2106_v10, %v1702_v9  ;;  %v2120_v15 = vld [vmem:[#allocation5 + $0x164] sm:$0xf0]  ;;  %1014 = vmatpush.bf16.msra.mxu2 %v1767_v7  ;;  %v1822_v18 = vld [vmem:[#allocation5 + $0x1e0] sm:$0xf]  ;;  %v1622_v23 = vld [vmem:[#allocation5 + $0x50] sm:$0xf] }
  0x46   : > { %1028 = vmatpush.bf16.msra.mxu3 %v1831_v8  ;;  %v1759_v17 = vor.u32 %v2120_v15, %v1758_v14  ;;  %v2136_v19 = vld [vmem:[#allocation5 + $0x1e4] sm:$0xf0]  ;;  %v1694_v20 = vld [vmem:[#allocation5 + $0xe0] sm:$0xf]  ;;  %v2086_v24 = vld [vmem:[#allocation5 + $0x54] sm:$0xf0] }
  0x47   : > { %1000 = vmatpush.bf16.msra.mxu1 %v1703_v12  ;;  %v1823_v21 = vor.u32 %v2136_v19, %v1822_v18  ;;  %v2104_v22 = vld [vmem:[#allocation5 + $0xe4] sm:$0xf0]  ;;  %v1750_v26 = vld [vmem:[#allocation5 + $0x150] sm:$0xf]  ;;  %v2118_v27 = vld [vmem:[#allocation5 + $0x154] sm:$0xf0]  ;;  %v1623_v29 = vor.u32 %v2086_v24, %v1622_v23 }
  0x48   : > { %v1695_v25 = vor.u32 %v2104_v22, %v1694_v20  ;;  %v1814_v28 = vld [vmem:[#allocation5 + $0x1d0] sm:$0xf]  ;;  %987 = vmatpush.bf16.msra.mxu0 %v1631_v16  ;;  %v2134_v30 = vld [vmem:[#allocation5 + $0x1d4] sm:$0xf0]  ;;  %v1751_v33 = vor.u32 %v2118_v27, %v1750_v26  ;;  %v1614_v35 = vld [vmem:[#allocation5 + $0x40] sm:$0xf] }
  0x49   : > { %v1686_v31 = vld [vmem:[#allocation5 + $0xd0] sm:$0xf]  ;;  %v2102_v32 = vld [vmem:[#allocation5 + $0xd4] sm:$0xf0]  ;;  %1015 = vmatpush.bf16.msra.mxu2 %v1759_v17  ;;  %v1815_v34 = vor.u32 %v2134_v30, %v1814_v28  ;;  %v2084_v36 = vld [vmem:[#allocation5 + $0x44] sm:$0xf0] }
  0x4a   : > { %1029 = vmatpush.bf16.msra.mxu3 %v1823_v21  ;;  %v1742_v37 = vld [vmem:[#allocation5 + $0x140] sm:$0xf]  ;;  %v1687_v38 = vor.u32 %v2102_v32, %v1686_v31  ;;  %v2116_v39 = vld [vmem:[#allocation5 + $0x144] sm:$0xf0]  ;;  %v1615_v44 = vor.u32 %v2084_v36, %v1614_v35  ;;  %v1606_v47 = vld [vmem:[#allocation5 + $0x30] sm:$0xf] }
  0x4b   : > { %1001 = vmatpush.bf16.msra.mxu1 %v1695_v25  ;;  %v1806_v40 = vld [vmem:[#allocation5 + $0x1c0] sm:$0xf]  ;;  %v2132_v41 = vld [vmem:[#allocation5 + $0x1c4] sm:$0xf0]  ;;  %v1743_v45 = vor.u32 %v2116_v39, %v1742_v37  ;;  %v2082_v48 = vld [vmem:[#allocation5 + $0x34] sm:$0xf0] }
  0x4c   : > { %v1678_v42 = vld [vmem:[#allocation5 + $0xc0] sm:$0xf]  ;;  %v2100_v43 = vld [vmem:[#allocation5 + $0xc4] sm:$0xf0]  ;;  %988 = vmatpush.bf16.msra.mxu0 %v1623_v29  ;;  %v1807_v46 = vor.u32 %v2132_v41, %v1806_v40  ;;  %v1734_v49 = vld [vmem:[#allocation5 + $0x130] sm:$0xf]  ;;  %v1607_v56 = vor.u32 %v2082_v48, %v1606_v47 }
  0x4d   : > { %1016 = vmatpush.bf16.msra.mxu2 %v1751_v33  ;;  %v1679_v50 = vor.u32 %v2100_v43, %v1678_v42  ;;  %v2114_v51 = vld [vmem:[#allocation5 + $0x134] sm:$0xf0]  ;;  %v1798_v52 = vld [vmem:[#allocation5 + $0x1b0] sm:$0xf]  ;;  %v1598_v59 = vld [vmem:[#allocation5 + $0x20] sm:$0xf] }
  0x4e   : > { %1030 = vmatpush.bf16.msra.mxu3 %v1815_v34  ;;  %v2130_v53 = vld [vmem:[#allocation5 + $0x1b4] sm:$0xf0]  ;;  %v1670_v54 = vld [vmem:[#allocation5 + $0xb0] sm:$0xf]  ;;  %v1735_v57 = vor.u32 %v2114_v51, %v1734_v49  ;;  %v2080_v60 = vld [vmem:[#allocation5 + $0x24] sm:$0xf0] }
  0x4f   : > { %1002 = vmatpush.bf16.msra.mxu1 %v1687_v38  ;;  %v2098_v55 = vld [vmem:[#allocation5 + $0xb4] sm:$0xf0]  ;;  %v1799_v58 = vor.u32 %v2130_v53, %v1798_v52  ;;  %v1726_v61 = vld [vmem:[#allocation5 + $0x120] sm:$0xf]  ;;  %v2112_v63 = vld [vmem:[#allocation5 + $0x124] sm:$0xf0]  ;;  %v1599_v4 = vor.u32 %v2080_v60, %v1598_v59 }
  0x50   : > { %989 = vmatpush.bf16.msra.mxu0 %v1615_v44  ;;  %v1671_v62 = vor.u32 %v2098_v55, %v1670_v54  ;;  %v1790_v0 = vld [vmem:[#allocation5 + $0x1a0] sm:$0xf]  ;;  %v2128_v1 = vld [vmem:[#allocation5 + $0x1a4] sm:$0xf0]  ;;  %v1590_v5 = vld [vmem:[#allocation5 + $0x10] sm:$0xf]  ;;  %v1727_v6 = vor.u32 %v2112_v63, %v1726_v61 }
  0x51   : > { %1017 = vmatpush.bf16.msra.mxu2 %v1743_v45  ;;  %v1662_v2 = vld [vmem:[#allocation5 + $0xa0] sm:$0xf]  ;;  %v2096_v3 = vld [vmem:[#allocation5 + $0xa4] sm:$0xf0]  ;;  %v1791_v7 = vor.u32 %v2128_v1, %v1790_v0  ;;  %v2078_v8 = vld [vmem:[#allocation5 + $0x14] sm:$0xf0] }
  0x52   : > { %1031 = vmatpush.bf16.msra.mxu3 %v1807_v46  ;;  %v1718_v9 = vld [vmem:[#allocation5 + $0x110] sm:$0xf]  ;;  %v2110_v10 = vld [vmem:[#allocation5 + $0x114] sm:$0xf0]  ;;  %v1663_v11 = vor.u32 %v2096_v3, %v1662_v2  ;;  %v1582_v16 = vld [vmem:[#allocation5] sm:$0xf]  ;;  %v1591_v18 = vor.u32 %v2078_v8, %v1590_v5 }
  0x53   : > { %1003 = vmatpush.bf16.msra.mxu1 %v1679_v50  ;;  %v1782_v12 = vld [vmem:[#allocation5 + $0x190] sm:$0xf]  ;;  %v2126_v13 = vld [vmem:[#allocation5 + $0x194] sm:$0xf0]  ;;  %v2076_v17 = vld [vmem:[#allocation5 + $0x4] sm:$0xf0]  ;;  %v1719_v23 = vor.u32 %v2110_v10, %v1718_v9 }
  0x54   : > { %990 = vmatpush.bf16.msra.mxu0 %v1607_v56  ;;  %v1654_v14 = vld [vmem:[#allocation5 + $0x90] sm:$0xf]  ;;  %v2094_v15 = vld [vmem:[#allocation5 + $0x94] sm:$0xf0]  ;;  %v1710_v19 = vld [vmem:[#allocation5 + $0x100] sm:$0xf]  ;;  %v1783_v24 = vor.u32 %v2126_v13, %v1782_v12  ;;  %v1583_v35 = vor.u32 %v2076_v17, %v1582_v16 }
  0x55   : > { %1018 = vmatpush.bf16.msra.mxu2 %v1735_v57  ;;  %v2108_v20 = vld [vmem:[#allocation5 + $0x104] sm:$0xf0]  ;;  %v1774_v21 = vld [vmem:[#allocation5 + $0x180] sm:$0xf]  ;;  %v1894_v25 = vld [vmem:[#allocation5 + $0x270] sm:$0xf]  ;;  %v1655_v28 = vor.u32 %v2094_v15, %v1654_v14 }
  0x56   : > { %1032 = vmatpush.bf16.msra.mxu3 %v1799_v58  ;;  %v2124_v22 = vld [vmem:[#allocation5 + $0x184] sm:$0xf0]  ;;  %v2154_v26 = vld [vmem:[#allocation5 + $0x274] sm:$0xf0]  ;;  %v2089_v27 = vld [vmem:[#allocation5 + $0x74] sm:$0xf]  ;;  %v1711_v39 = vor.u32 %v2108_v20, %v1710_v19 }
  0x57   : > { %1004 = vmatpush.bf16.msra.mxu1 %v1671_v62  ;;  %v1640_v29 = vld [vmem:[#allocation5 + $0x78] sm:$0xf0]  ;;  %v1646_v30 = vld [vmem:[#allocation5 + $0x80] sm:$0xf]  ;;  %v2092_v31 = vld [vmem:[#allocation5 + $0x84] sm:$0xf0]  ;;  %v1775_v40 = vor.u32 %v2124_v22, %v1774_v21  ;;  %v1895_v44 = vor.u32 %v2154_v26, %v1894_v25 }
  0x58   : > { %991 = vmatpush.bf16.msra.mxu0 %v1599_v4  ;;  %v369_v32 = vld [vmem:[%s2699_s1 + $0x10] sm:$0xff]  ;;  %v376_v33 = vld [vmem:[%s2699_s1 + $0x48] sm:$0xff]  ;;  %v367_v43 = vld [vmem:[%s2699_s1] sm:$0xff]  ;;  %v1643_v45 = vor.u32 %v2089_v27, %v1640_v29  ;;  %v1647_v49 = vor.u32 %v2092_v31, %v1646_v30  ;;  %vm982_vm0 = vcmask 130048   ;;  %s1579_s29 = sshll.u32 %s2695_s2, 3  ;;  %s2197_s19 = sshll.u32 %s2602_s28, 3 }
  0x59   : > { %1019 = vmatpush.bf16.msra.mxu2 %v1727_v6  ;;  %v1958_v34 = vld [vmem:[#allocation5 + $0x2f0] sm:$0xf]  ;;  %v2170_v36 = vld [vmem:[#allocation5 + $0x2f4] sm:$0xf0]  ;;  %v1966_v37 = vld [vmem:[#allocation5 + $0x300] sm:$0xf]  ;;  %v2719_v54 = vpack.c.bf16 %v376_v33, %v369_v32  ;;  %s1449_s22 = scalar_lea.hbm %s2808_s7, %s2197_s19 }
  0x5a   : > { %1033 = vmatpush.bf16.msra.mxu3 %v1791_v7  ;;  %v2172_v38 = vld [vmem:[#allocation5 + $0x304] sm:$0xf0]  ;;  %v2105_v41 = vld [vmem:[#allocation5 + $0xf4] sm:$0xf]  ;;  %v1704_v42 = vld [vmem:[#allocation5 + $0xf8] sm:$0xf0]  ;;  %v1959_v55 = vor.u32 %v2170_v36, %v1958_v34 }
  0x5b   : > { %1005 = vmatpush.bf16.msra.mxu1 %v1663_v11  ;;  %v374_v46 = vld [vmem:[%s2699_s1 + $0x38] sm:$0xff]  ;;  %v377_v48 = vld [vmem:[%s2699_s1 + $0x50] sm:$0xff]  ;;  %v1967_v50 = vor.u32 %v2172_v38, %v1966_v37  ;;  %v368_v57 = vld [vmem:[%s2699_s1 + $0x8] sm:$0xff]  ;;  %v1707_v59 = vor.u32 %v2105_v41, %v1704_v42  ;;  %s363_s16 = scalar_lea.vmem [#allocation11], %s1579_s29  ;;  %s1452_s11 = sshll.u32 %s1449_s22, 4  ;;  %s1453_s11 = int_to_ptr.hbm [resolvable:$true] %s1452_s11 }
  0x5c   : > { %992 = vmatpush.bf16.msra.mxu0 %v1591_v18  ;;  %v370_v47 = vld [vmem:[%s2699_s1 + $0x18] sm:$0xff]  ;;  %v1886_v51 = vld [vmem:[#allocation5 + $0x260] sm:$0xf]  ;;  %v2087_v53 = vld [vmem:[#allocation5 + $0x64] sm:$0xf]  ;;  %v2723_v60 = vpack.c.bf16 %v374_v46, %v367_v43  ;;  %s1450_s23 = sshll.u32 %s363_s16, 4  ;;  %s1451_s23 = int_to_ptr.vmem [resolvable:$true] %s1450_s23 }
  0x5d   : > { %1020 = vmatpush.bf16.msra.mxu2 %v1719_v23  ;;  %v2152_v52 = vld [vmem:[#allocation5 + $0x264] sm:$0xf0]  ;;  %v1632_v56 = vld [vmem:[#allocation5 + $0x68] sm:$0xf0]  ;;  %v375_v58 = vld [vmem:[%s2699_s1 + $0x40] sm:$0xff]  ;;  %v2725_v63 = vpack.c.bf16 %v377_v48, %v370_v47  ;;  %s1438_s28 = scalar_lea.sflag [#allocation4], %s2695_s2 }
  0x5e   : > { %1034 = vmatpush.bf16.msra.mxu3 %v1783_v24  ;;  %v1950_v61 = vld [vmem:[#allocation5 + $0x2e0] sm:$0xf]  ;;  %v2168_v62 = vld [vmem:[#allocation5 + $0x2e4] sm:$0xf0]  ;;  %v1887_v0 = vor.u32 %v2152_v52, %v1886_v51  ;;  %v2103_v1 = vld [vmem:[#allocation5 + $0xe4] sm:$0xf]  ;;  %v1635_v3 = vor.u32 %v2087_v53, %v1632_v56  ;;  %v2727_v4 = vpack.c.bf16 %v375_v58, %v368_v57 }
  0x5f   : > { %1006 = vmatpush.bf16.msra.mxu1 %v1655_v28  ;;  %v1696_v2 = vld [vmem:[#allocation5 + $0xe8] sm:$0xf0]  ;;  %v1878_v5 = vld [vmem:[#allocation5 + $0x250] sm:$0xf]  ;;  %v2150_v6 = vld [vmem:[#allocation5 + $0x254] sm:$0xf0]  ;;  %v1951_v7 = vor.u32 %v2168_v62, %v1950_v61 }
  0x60   : > { %993 = vmatpush.bf16.msra.mxu0 %v1583_v35  ;;  %v2085_v8 = vld [vmem:[#allocation5 + $0x54] sm:$0xf]  ;;  %v1624_v9 = vld [vmem:[#allocation5 + $0x58] sm:$0xf0]  ;;  %v1699_v10 = vor.u32 %v2103_v1, %v1696_v2  ;;  %v1942_v11 = vld [vmem:[#allocation5 + $0x2d0] sm:$0xf]  ;;  %v1879_v13 = vor.u32 %v2150_v6, %v1878_v5 }
  0x61   : > { %1021 = vmatpush.bf16.msra.mxu2 %v1711_v39  ;;  %v2166_v12 = vld [vmem:[#allocation5 + $0x2d4] sm:$0xf0]  ;;  %v2101_v14 = vld [vmem:[#allocation5 + $0xd4] sm:$0xf]  ;;  %v1688_v15 = vld [vmem:[#allocation5 + $0xd8] sm:$0xf0]  ;;  %v1627_v16 = vor.u32 %v2085_v8, %v1624_v9 }
  0x62   : > { %1035 = vmatpush.bf16.msra.mxu3 %v1775_v40  ;;  %v1870_v17 = vld [vmem:[#allocation5 + $0x240] sm:$0xf]  ;;  %v2148_v18 = vld [vmem:[#allocation5 + $0x244] sm:$0xf0]  ;;  %v1943_v19 = vor.u32 %v2166_v12, %v1942_v11  ;;  %v2083_v20 = vld [vmem:[#allocation5 + $0x44] sm:$0xf]  ;;  %v1691_v22 = vor.u32 %v2101_v14, %v1688_v15 }
  0x63   : > { %1007 = vmatpush.bf16.msra.mxu1 %v1647_v49  ;;  %994 = vmatmul.bf16.vlgmr.msra.gmra.mxu0 %v2723_v60  ;;  %v1616_v21 = vld [vmem:[#allocation5 + $0x48] sm:$0xf0]  ;;  %v1934_v23 = vld [vmem:[#allocation5 + $0x2c0] sm:$0xf]  ;;  %v2164_v24 = vld [vmem:[#allocation5 + $0x2c4] sm:$0xf0]  ;;  %v1871_v25 = vor.u32 %v2148_v18, %v1870_v17 }
  0x64   : > { %1042 = vmatpush.bf16.msrb.mxu0 %v1895_v44  ;;  %1022 = vmatmul.bf16.vlgmr.msra.gmra.mxu2 %v2719_v54  ;;  %v2099_v26 = vld [vmem:[#allocation5 + $0xc4] sm:$0xf]  ;;  %v1680_v27 = vld [vmem:[#allocation5 + $0xc8] sm:$0xf0]  ;;  %v1619_v28 = vor.u32 %v2083_v20, %v1616_v21  ;;  %v1862_v29 = vld [vmem:[#allocation5 + $0x230] sm:$0xf]  ;;  %v1935_v31 = vor.u32 %v2164_v24, %v1934_v23 }
  0x65   : > { %1077 = vmatpush.bf16.msrb.mxu2 %v1967_v50  ;;  %1036 = vmatmul.bf16.vlgmr.msra.gmra.mxu3 %v2725_v63  ;;  %v2146_v30 = vld [vmem:[#allocation5 + $0x234] sm:$0xf0]  ;;  %v2081_v32 = vld [vmem:[#allocation5 + $0x34] sm:$0xf]  ;;  %v1608_v33 = vld [vmem:[#allocation5 + $0x38] sm:$0xf0]  ;;  %v1683_v35 = vor.u32 %v2099_v26, %v1680_v27 }
  0x66   : > { %1084 = vmatpush.bf16.msrb.mxu3 %v1643_v45  ;;  %1008 = vmatmul.bf16.vlgmr.msra.gmra.mxu1 %v2727_v4  ;;  %v1926_v34 = vld [vmem:[#allocation5 + $0x2b0] sm:$0xf]  ;;  %v2162_v36 = vld [vmem:[#allocation5 + $0x2b4] sm:$0xf0]  ;;  %v1863_v39 = vor.u32 %v2146_v30, %v1862_v29  ;;  %v2097_v40 = vld [vmem:[#allocation5 + $0xb4] sm:$0xf]  ;;  %v1611_v42 = vor.u32 %v2081_v32, %v1608_v33 }
  0x67   : > { %1056 = vmatpush.bf16.msrb.mxu1 %v1959_v55  ;;  %v373_v37 = vld [vmem:[%s2699_s1 + $0x30] sm:$0xff]  ;;  %v380_v38 = vld [vmem:[%s2699_s1 + $0x68] sm:$0xff]  ;;  %v1927_v45 = vor.u32 %v2162_v36, %v1926_v34  ;;  %v371_v20 = vld [vmem:[%s2699_s1 + $0x20] sm:$0xff]  ;;  %s2467_s15 = sshra.s32 %s1453_s11, 4  ;;  %s2473_s30 = scalar_lea.hbm %s2808_s7, 16  ;;  %s2468_s15 = int_to_ptr.hbm [resolvable:$true] %s2467_s15 }
  0x68   : > { %1043 = vmatpush.bf16.msrb.mxu0 %v1887_v0  ;;  %v1672_v41 = vld [vmem:[#allocation5 + $0xb8] sm:$0xf0]  ;;  %v1854_v43 = vld [vmem:[#allocation5 + $0x220] sm:$0xf]  ;;  %v2144_v44 = vld [vmem:[#allocation5 + $0x224] sm:$0xf0]  ;;  %v2735_v48 = vpack.c.bf16 %v380_v38, %v373_v37  ;;  %p2474_p11 = scmp.lt.s32.totalorder %s2468_s15, %s2808_s7 }
  0x69   : > { %1098 = vmatpush.bf16.msra.mxu2 %v1707_v59  ;;  %v2079_v46 = vld [vmem:[#allocation5 + $0x24] sm:$0xf]  ;;  %v1600_v47 = vld [vmem:[#allocation5 + $0x28] sm:$0xf0]  ;;  %v1675_v49 = vor.u32 %v2097_v40, %v1672_v41  ;;  %v1918_v50 = vld [vmem:[#allocation5 + $0x2a0] sm:$0xf]  ;;  %v1855_v52 = vor.u32 %v2144_v44, %v1854_v43 }
  0x6a   : > { %1085 = vmatpush.bf16.msrb.mxu3 %v1635_v3  ;;  %v2160_v51 = vld [vmem:[#allocation5 + $0x2a4] sm:$0xf0]  ;;  %v2095_v53 = vld [vmem:[#allocation5 + $0xa4] sm:$0xf]  ;;  %v1664_v55 = vld [vmem:[#allocation5 + $0xa8] sm:$0xf0]  ;;  %v1603_v56 = vor.u32 %v2079_v46, %v1600_v47 }
  0x6b   : > { %1057 = vmatpush.bf16.msrb.mxu1 %v1951_v7  ;;  %v1846_v57 = vld [vmem:[#allocation5 + $0x210] sm:$0xf]  ;;  %v2142_v58 = vld [vmem:[#allocation5 + $0x214] sm:$0xf0]  ;;  %v2077_v59 = vld [vmem:[#allocation5 + $0x14] sm:$0xf]  ;;  %v1919_v61 = vor.u32 %v2160_v51, %v1918_v50  ;;  %v1667_v2 = vor.u32 %v2095_v53, %v1664_v55 }
  0x6c   : > { %1044 = vmatpush.bf16.msrb.mxu0 %v1879_v13  ;;  %v1592_v62 = vld [vmem:[#allocation5 + $0x18] sm:$0xf0]  ;;  %v1910_v0 = vld [vmem:[#allocation5 + $0x290] sm:$0xf]  ;;  %v2158_v1 = vld [vmem:[#allocation5 + $0x294] sm:$0xf0]  ;;  %v1847_v7 = vor.u32 %v2142_v58, %v1846_v57 }
  0x6d   : > { %1099 = vmatpush.bf16.msra.mxu2 %v1699_v10  ;;  %v2093_v3 = vld [vmem:[#allocation5 + $0x94] sm:$0xf]  ;;  %v1656_v5 = vld [vmem:[#allocation5 + $0x98] sm:$0xf0]  ;;  %v1838_v6 = vld [vmem:[#allocation5 + $0x200] sm:$0xf]  ;;  %v1595_v11 = vor.u32 %v2077_v59, %v1592_v62  ;;  %v1911_v15 = vor.u32 %v2158_v1, %v1910_v0 }
  0x6e   : > { %1086 = vmatpush.bf16.msrb.mxu3 %v1627_v16  ;;  %v2140_v8 = vld [vmem:[#allocation5 + $0x204] sm:$0xf0]  ;;  %v2075_v9 = vld [vmem:[#allocation5 + $0x4] sm:$0xf]  ;;  %v1584_v10 = vld [vmem:[#allocation5 + $0x8] sm:$0xf0] }
  0x6f   : > { %1058 = vmatpush.bf16.msrb.mxu1 %v1943_v19  ;;  %v2121_v12 = vld [vmem:[#allocation5 + $0x174] sm:$0xf]  ;;  %v1768_v13 = vld [vmem:[#allocation5 + $0x178] sm:$0xf0]  ;;  %v1902_v17 = vld [vmem:[#allocation5 + $0x280] sm:$0xf]  ;;  %v1659_v19 = vor.u32 %v2093_v3, %v1656_v5  ;;  %v1839_v23 = vor.u32 %v2140_v8, %v1838_v6  ;;  %v1587_v27 = vor.u32 %v2075_v9, %v1584_v10 }
  0x70   : > { %1045 = vmatpush.bf16.msrb.mxu0 %v1871_v25  ;;  %v2153_v14 = vld [vmem:[#allocation5 + $0x274] sm:$0xf]  ;;  %v1896_v16 = vld [vmem:[#allocation5 + $0x278] sm:$0xf0]  ;;  %v2156_v18 = vld [vmem:[#allocation5 + $0x284] sm:$0xf0] }
  0x71   : > { %1100 = vmatpush.bf16.msra.mxu2 %v1691_v22  ;;  %v378_v21 = vld [vmem:[%s2699_s1 + $0x58] sm:$0xff]  ;;  %v2091_v22 = vld [vmem:[#allocation5 + $0x84] sm:$0xf]  ;;  %v2137_v25 = vld [vmem:[#allocation5 + $0x1f4] sm:$0xf]  ;;  %v1899_v32 = vor.u32 %v2153_v14, %v1896_v16  ;;  %v1903_v33 = vor.u32 %v2156_v18, %v1902_v17  ;;  %s2469_s3 = scalar_lea.hbm %s2468_s15, 8 }
  0x72   : > { %1087 = vmatpush.bf16.msrb.mxu3 %v1619_v28  ;;  %v1648_v24 = vld [vmem:[#allocation5 + $0x88] sm:$0xf0]  ;;  %v1832_v26 = vld [vmem:[#allocation5 + $0x1f8] sm:$0xf0]  ;;  %v1771_v28 = vor.u32 %v2121_v12, %v1768_v13  ;;  %v2169_v29 = vld [vmem:[#allocation5 + $0x2f4] sm:$0xf]  ;;  %v2743_v37 = vpack.c.bf16 %v378_v21, %v371_v20  ;;  %p2470_p1 = scmp.ne.s32.totalorder %s2468_s15, %s2469_s3  ;;  %p2475_p9 = scmp.lt.s32.totalorder %s2473_s30, %s2469_s3 }
  0x73   : > { %1059 = vmatpush.bf16.msrb.mxu1 %v1935_v31  ;;  %v1960_v30 = vld [vmem:[#allocation5 + $0x2f8] sm:$0xf0]  ;;  %v379_v34 = vld [vmem:[%s2699_s1 + $0x60] sm:$0xff]  ;;  %v1760_v36 = vld [vmem:[#allocation5 + $0x168] sm:$0xf0]  ;;  %v1651_v38 = vor.u32 %v2091_v22, %v1648_v24  ;;  %v1835_v41 = vor.u32 %v2137_v25, %v1832_v26 }
  0x74   : > { %1046 = vmatpush.bf16.msrb.mxu0 %v1863_v39  ;;  %1972 = vmatmul.msk.bf16.vlgmr.msrb.gmra.mxu2 %vm982_vm0, %v2735_v48  ;;  %v372_v31 = vld [vmem:[%s2699_s1 + $0x28] sm:$0xff]  ;;  %v2151_v39 = vld [vmem:[#allocation5 + $0x264] sm:$0xf]  ;;  %v2117_v51 = vld [vmem:[#allocation5 + $0x154] sm:$0xf]  ;;  %p2471_p4 = pnand %p2470_p1, %p2665_p3  ;;  %p2476_p2 = por %p2475_p9, %p2474_p11 }
  0x75   : > { %1101 = vmatpush.bf16.msra.mxu2 %v1683_v35  ;;  %v2119_v35 = vld [vmem:[#allocation5 + $0x164] sm:$0xf]  ;;  %v1888_v40 = vld [vmem:[#allocation5 + $0x268] sm:$0xf0]  ;;  %v2745_v44 = vpack.c.bf16 %v379_v34, %v372_v31  ;;  %v2149_v53 = vld [vmem:[#allocation5 + $0x254] sm:$0xf] }
  0x76   : > { %1088 = vmatpush.bf16.msrb.mxu3 %v1611_v42  ;;  %v1963_v42 = vor.u32 %v2169_v29, %v1960_v30  ;;  %v2135_v43 = vld [vmem:[#allocation5 + $0x1e4] sm:$0xf]  ;;  %v1824_v46 = vld [vmem:[#allocation5 + $0x1e8] sm:$0xf0]  ;;  %v1891_v50 = vor.u32 %v2151_v39, %v1888_v40  ;;  %v1880_v55 = vld [vmem:[#allocation5 + $0x258] sm:$0xf0]  ;;  %p2472_p8 = pneg %p2471_p4 }
  0x77   : > { %1060 = vmatpush.bf16.msrb.mxu1 %v1927_v45  ;;  %v1763_v45 = vor.u32 %v2119_v35, %v1760_v36  ;;  %v2167_v47 = vld [vmem:[#allocation5 + $0x2e4] sm:$0xf]  ;;  %v2133_v58 = vld [vmem:[#allocation5 + $0x1d4] sm:$0xf]  ;;  %v1944_v0 = vld [vmem:[#allocation5 + $0x2d8] sm:$0xf0]  ;;  %v1883_v1 = vor.u32 %v2149_v53, %v1880_v55 }
  0x78   : > { %1047 = vmatpush.bf16.msrb.mxu0 %v1855_v52  ;;  %v1752_v52 = vld [vmem:[#allocation5 + $0x158] sm:$0xf0]  ;;  %v2165_v62 = vld [vmem:[#allocation5 + $0x2d4] sm:$0xf]  ;;  %v1744_v3 = vld [vmem:[#allocation5 + $0x148] sm:$0xf0]  ;;  %p2477_p10 = pnand %p2476_p2, %p2472_p8 }
  0x79   : > { %1102 = vmatpush.bf16.msra.mxu2 %v1675_v49  ;;  %v1952_v49 = vld [vmem:[#allocation5 + $0x2e8] sm:$0xf0]  ;;  %v1755_v59 = vor.u32 %v2117_v51, %v1752_v52  ;;  %v2147_v5 = vld [vmem:[#allocation5 + $0x244] sm:$0xf]  ;;  %v1947_v8 = vor.u32 %v2165_v62, %v1944_v0  ;;  %v2145_v16 = vld [vmem:[#allocation5 + $0x234] sm:$0xf] }
  0x7a   : > { %1089 = vmatpush.bf16.msrb.mxu3 %v1603_v56  ;;  %v1827_v56 = vor.u32 %v2135_v43, %v1824_v46  ;;  %v1955_v57 = vor.u32 %v2167_v47, %v1952_v49  ;;  %v1872_v6 = vld [vmem:[#allocation5 + $0x248] sm:$0xf0]  ;;  %v2131_v9 = vld [vmem:[#allocation5 + $0x1c4] sm:$0xf]  ;;  %v1864_v17 = vld [vmem:[#allocation5 + $0x238] sm:$0xf0] }
  0x7b   : > { %1061 = vmatpush.bf16.msrb.mxu1 %v1919_v61  ;;  %v1816_v61 = vld [vmem:[#allocation5 + $0x1d8] sm:$0xf0]  ;;  %v1808_v10 = vld [vmem:[#allocation5 + $0x1c8] sm:$0xf0]  ;;  %v1875_v14 = vor.u32 %v2147_v5, %v1872_v6  ;;  %v2161_v22 = vld [vmem:[#allocation5 + $0x2b4] sm:$0xf]  ;;  %v1867_v24 = vor.u32 %v2145_v16, %v1864_v17 }
  0x7c   : > { %1048 = vmatpush.bf16.msrb.mxu0 %v1847_v7  ;;  %v1819_v7 = vor.u32 %v2133_v58, %v1816_v61  ;;  %v1936_v13 = vld [vmem:[#allocation5 + $0x2c8] sm:$0xf0]  ;;  %v1800_v21 = vld [vmem:[#allocation5 + $0x1b8] sm:$0xf0]  ;;  %v2111_v25 = vld [vmem:[#allocation5 + $0x124] sm:$0xf] }
  0x7d   : > { %1103 = vmatpush.bf16.msra.mxu2 %v1667_v2  ;;  %v2115_v2 = vld [vmem:[#allocation5 + $0x144] sm:$0xf]  ;;  %v1728_v26 = vld [vmem:[#allocation5 + $0x128] sm:$0xf0]  ;;  %v1720_v39 = vld [vmem:[#allocation5 + $0x118] sm:$0xf0] }
  0x7e   : > { %1090 = vmatpush.bf16.msrb.mxu3 %v1595_v11  ;;  %v2163_v11 = vld [vmem:[#allocation5 + $0x2c4] sm:$0xf]  ;;  %v1747_v12 = vor.u32 %v2115_v2, %v1744_v3  ;;  %v1920_v35 = vld [vmem:[#allocation5 + $0x2a8] sm:$0xf0]  ;;  %v2141_v40 = vld [vmem:[#allocation5 + $0x214] sm:$0xf] }
  0x7f   : > { %1062 = vmatpush.bf16.msrb.mxu1 %v1911_v15  ;;  %v2113_v15 = vld [vmem:[#allocation5 + $0x134] sm:$0xf]  ;;  %v1939_v18 = vor.u32 %v2163_v11, %v1936_v13  ;;  %v2127_v31 = vld [vmem:[#allocation5 + $0x1a4] sm:$0xf]  ;;  %v1784_v47 = vld [vmem:[#allocation5 + $0x198] sm:$0xf0] }
  0x80   : > { %1049 = vmatpush.bf16.msrb.mxu0 %v1839_v23  ;;  %v1928_v23 = vld [vmem:[#allocation5 + $0x2b8] sm:$0xf0]  ;;  %v2159_v34 = vld [vmem:[#allocation5 + $0x2a4] sm:$0xf]  ;;  %v2157_v49 = vld [vmem:[#allocation5 + $0x294] sm:$0xf] }
  0x81   : > { %1104 = vmatpush.bf16.msra.mxu2 %v1659_v19  ;;  %v2129_v19 = vld [vmem:[#allocation5 + $0x1b4] sm:$0xf]  ;;  %v1931_v30 = vor.u32 %v2161_v22, %v1928_v23  ;;  %v1923_v43 = vor.u32 %v2159_v34, %v1920_v35  ;;  %v2107_v52 = vld [vmem:[#allocation5 + $0x104] sm:$0xf]  ;;  %v1712_v53 = vld [vmem:[#allocation5 + $0x108] sm:$0xf0] }
  0x82   : > { %1091 = vmatpush.bf16.msrb.mxu3 %v1587_v27  ;;  %v2143_v27 = vld [vmem:[#allocation5 + $0x224] sm:$0xf]  ;;  %v1803_v29 = vor.u32 %v2129_v19, %v1800_v21  ;;  %v1776_v62 = vld [vmem:[#allocation5 + $0x188] sm:$0xf0]  ;;  %v2178_v11 = vld [vmem:[#allocation8 + $0x28] sm:$0xff] }
  0x83   : > { %1063 = vmatpush.bf16.msrb.mxu1 %v1903_v33  ;;  %1050 = vmatmul.bf16.vlgmr.msrb.gmra.mxu0 %v2743_v37  ;;  %v1792_v33 = vld [vmem:[#allocation5 + $0x1a8] sm:$0xf0]  ;;  %v2139_v55 = vld [vmem:[#allocation5 + $0x204] sm:$0xf]  ;;  %v2174_v13 = vld [vmem:[#allocation8 + $0x8] sm:$0xff] }
  0x84   : > { %1112 = vmatpush.bf16.msra.mxu0 %v1771_v28  ;;  %v1856_v28 = vld [vmem:[#allocation5 + $0x228] sm:$0xf0]  ;;  %v2123_v61 = vld [vmem:[#allocation5 + $0x184] sm:$0xf] }
  0x85   : > { %1105 = vmatpush.bf16.msra.mxu2 %v1651_v38  ;;  %1092 = vmatmul.bf16.vlgmr.msrb.gmra.mxu3 %v2723_v60  ;;  %v1811_v60 = vor.u32 %v2131_v9, %v1808_v10  ;;  %v1859_v36 = vor.u32 %v2143_v27, %v1856_v28  ;;  %v2109_v38 = vld [vmem:[#allocation5 + $0x114] sm:$0xf]  ;;  %v1904_v2 = vld [vmem:[#allocation5 + $0x288] sm:$0xf0]  ;;  %v2171_v3 = vld [vmem:[#allocation5 + $0x304] sm:$0xf]  ;;  %v1779_v6 = vor.u32 %v2123_v61, %v1776_v62 }
  0x86   : > { %1140 = vmatpush.bf16.msra.mxu3 %v1899_v32  ;;  %1064 = vmatmul.bf16.vlgmr.msrb.gmra.mxu1 %v2745_v44  ;;  %v1731_v32 = vor.u32 %v2111_v25, %v1728_v26  ;;  %v1723_v46 = vor.u32 %v2109_v38, %v1720_v39  ;;  %v1968_v5 = vld [vmem:[#allocation5 + $0x308] sm:$0xf0]  ;;  %v2179_v10 = vld [vmem:[#allocation8 + $0x30] sm:$0xff] }
  0x87   : > { %1126 = vmatpush.bf16.msra.mxu1 %v1835_v41  ;;  %v1848_v41 = vld [vmem:[#allocation5 + $0x218] sm:$0xf0]  ;;  %v2180_v9 = vld [vmem:[#allocation8 + $0x38] sm:$0xff] }
  0x88   : > { %1113 = vmatpush.bf16.msra.mxu0 %v1763_v45  ;;  %1106 = vmatmul.bf16.vlgmr.msra.gmra.mxu2 %v2727_v4  ;;  %v1736_v4 = vld [vmem:[#allocation5 + $0x138] sm:$0xf0]  ;;  %v2125_v45 = vld [vmem:[#allocation5 + $0x194] sm:$0xf]  ;;  %v1851_v51 = vor.u32 %v2141_v40, %v1848_v41 }
  0x89   : > { %1154 = vmatpush.bf16.msrb.mxu2 %v1963_v42  ;;  %v1739_v20 = vor.u32 %v2113_v15, %v1736_v4  ;;  %v1795_v42 = vor.u32 %v2127_v31, %v1792_v33  ;;  %v2173_v15 = vld [vmem:[#allocation8] sm:$0xff]  ;;  %v2188_v31 = vld [vmem:[#allocation8 + $0x78] sm:$0xff] }
  0x8a   : > { %1141 = vmatpush.bf16.msra.mxu3 %v1891_v50  ;;  %v1912_v50 = vld [vmem:[#allocation5 + $0x298] sm:$0xf0] }
  0x8b   : > { %1127 = vmatpush.bf16.msra.mxu1 %v1827_v56  ;;  %v1840_v56 = vld [vmem:[#allocation5 + $0x208] sm:$0xf0]  ;;  %v1915_v58 = vor.u32 %v2157_v49, %v1912_v50 }
  0x8c   : > { %1114 = vmatpush.bf16.msra.mxu0 %v1755_v59  ;;  %v1715_v59 = vor.u32 %v2107_v52, %v1712_v53  ;;  %v1843_v0 = vor.u32 %v2139_v55, %v1840_v56  ;;  %v2183_v52 = vld [vmem:[#allocation8 + $0x50] sm:$0xff]  ;;  %v2182_v55 = vld [vmem:[#allocation8 + $0x48] sm:$0xff] }
  0x8d   : > { %1155 = vmatpush.bf16.msrb.mxu2 %v1955_v57  ;;  %v1787_v57 = vor.u32 %v2125_v45, %v1784_v47  ;;  %v2185_v47 = vld [vmem:[#allocation8 + $0x60] sm:$0xff] }
  0x8e   : > { %1142 = vmatpush.bf16.msra.mxu3 %v1883_v1  ;;  %v2155_v1 = vld [vmem:[#allocation5 + $0x284] sm:$0xf] }
  0x8f   : > { %1128 = vmatpush.bf16.msra.mxu1 %v1819_v7  ;;  %v1907_v7 = vor.u32 %v2155_v1, %v1904_v2 }
  0x90   : > { %1115 = vmatpush.bf16.msra.mxu0 %v1747_v12  ;;  %v2177_v12 = vld [vmem:[#allocation8 + $0x20] sm:$0xff] }
  0x91   : > { %1156 = vmatpush.bf16.msrb.mxu2 %v1947_v8  ;;  %v1971_v8 = vor.u32 %v2171_v3, %v1968_v5 }
  0x92   : > { %1143 = vmatpush.bf16.msra.mxu3 %v1875_v14 }
  0x93   : > { %1129 = vmatpush.bf16.msra.mxu1 %v1811_v60 }
  0x94   : > { %1116 = vmatpush.bf16.msra.mxu0 %v1739_v20 }
  0x95   : > { %1157 = vmatpush.bf16.msrb.mxu2 %v1939_v18 }
  0x96   : > { %1144 = vmatpush.bf16.msra.mxu3 %v1867_v24 }
  0x97   : > { %1130 = vmatpush.bf16.msra.mxu1 %v1803_v29 }
  0x98   : > { %1117 = vmatpush.bf16.msra.mxu0 %v1731_v32 }
  0x99   : > { %1158 = vmatpush.bf16.msrb.mxu2 %v1931_v30 }
  0x9a   : > { %1145 = vmatpush.bf16.msra.mxu3 %v1859_v36  ;;  %v2187_v36 = vld [vmem:[#allocation8 + $0x70] sm:$0xff] }
  0x9b   : > { %1131 = vmatpush.bf16.msra.mxu1 %v1795_v42 }
  0x9c   : > { %1118 = vmatpush.bf16.msra.mxu0 %v1723_v46 }
  0x9d   : > { %1159 = vmatpush.bf16.msrb.mxu2 %v1923_v43  ;;  %v2186_v43 = vld [vmem:[#allocation8 + $0x68] sm:$0xff] }
  0x9e   : > { %1146 = vmatpush.bf16.msra.mxu3 %v1851_v51  ;;  %v2184_v51 = vld [vmem:[#allocation8 + $0x58] sm:$0xff] }
  0x9f   : > { %1132 = vmatpush.bf16.msra.mxu1 %v1787_v57  ;;  %v2181_v57 = vld [vmem:[#allocation8 + $0x40] sm:$0xff] }
  0xa0   : > { %1119 = vmatpush.bf16.msra.mxu0 %v1715_v59 }
  0xa1   : > { %1160 = vmatpush.bf16.msrb.mxu2 %v1915_v58 }
  0xa2   : > { %1147 = vmatpush.bf16.msra.mxu3 %v1843_v0 }
  0xa3   : > { %1133 = vmatpush.bf16.msra.mxu1 %v1779_v6  ;;  %1120 = vmatmul.bf16.vlgmr.msra.gmra.mxu0 %v2719_v54  ;;  %v2176_v54 = vld [vmem:[#allocation8 + $0x18] sm:$0xff] }
  0xa5   : > { %1148 = vmatmul.bf16.vlgmr.msra.gmra.mxu3 %v2743_v37  ;;  %1161 = vmatpush.bf16.msrb.mxu2 %v1907_v7  ;;  %v2175_v37 = vld [vmem:[#allocation8 + $0x10] sm:$0xff] }
  0xa6   : > { %1134 = vmatmul.bf16.vlgmr.msra.gmra.mxu1 %v2725_v63  ;;  %v2757_v63 = vld [vmem:[#allocation7] sm:$0x3]  ;;  %1334 = vmatpush.bf16.msrb.mxu3 %v2188_v31 }
  0xa7   : > { %1320 = vmatpush.bf16.msrb.mxu1 %v2180_v9  ;;  %v488_v4 = vperm.slane %v2757_v63, 0  ;;  %v489_v62 = vperm.slane %v2757_v63, 1 }
  0xa8   : > { %1162 = vmatmul.bf16.vlgmr.msrb.gmra.mxu2 %v2745_v44 }
  0xa9   : > { %1175 = vmatpush.bf16.msra.mxu2 %v1971_v8 }
  0xaa   : > { %1335 = vmatpush.bf16.msrb.mxu3 %v2187_v36 }
  0xab   : > { %1321 = vmatpush.bf16.msrb.mxu1 %v2179_v10 }
  0xae   : > { %1336 = vmatpush.bf16.msrb.mxu3 %v2186_v43 }
  0xaf   : > { %1322 = vmatpush.bf16.msrb.mxu1 %v2178_v11 }
  0xb2   : > { %1337 = vmatpush.bf16.msrb.mxu3 %v2185_v47 }
  0xb3   : > { %1323 = vmatpush.bf16.msrb.mxu1 %v2177_v12 }
  0xb6   : > { %1338 = vmatpush.bf16.msrb.mxu3 %v2184_v51 }
  0xb7   : > { %1324 = vmatpush.bf16.msrb.mxu1 %v2176_v54 }
  0xb8   : > { %1973 = vmatmul.msk.bf16.vlgmr.msra.gmra.mxu2 %vm982_vm0, %v2735_v48 }
  0xba   : > { %1339 = vmatpush.bf16.msrb.mxu3 %v2183_v52 }
  0xbb   : > { %1325 = vmatpush.bf16.msrb.mxu1 %v2175_v37 }
  0xbe   : > { %1340 = vmatpush.bf16.msrb.mxu3 %v2182_v55 }
  0xbf   : > { %1326 = vmatpush.bf16.msrb.mxu1 %v2174_v13 }
  0xc2   : > { %1341 = vmatpush.bf16.msrb.mxu3 %v2181_v57 }
  0xc3   : > { %1327 = vmatpush.bf16.msrb.mxu1 %v2173_v15 }
  0xe0   : > { %v995_v44 = vpop.f32.mrf.mxu0 }
  0xe1   : > { %v996_v16 = vadd.f32 %v995_v44, %v488_v4 }
  0xe3   : > { %v1009_v48 = vpop.f32.mrf.mxu1 }
  0xe4   : > { %v1010_v60 = vadd.f32 %v1009_v48, %v996_v16 }
  0xe7   : > { %v1023_v14 = vpop.f32.mrf.mxu2 }
  0xe8   : > { %v997_v17 = vpop.f32.mrf.mxu0  ;;  %v1037_v19 = vpop.f32.mrf.mxu3  ;;  %v1024_v22 = vadd.f32 %v1023_v14, %v1010_v60 }
  0xe9   : > { %v998_v21 = vadd.f32 %v997_v17, %v488_v4 }
  0xea   : > { %v1038_v25 = vadd.f32 %v1037_v19, %v1024_v22  ;;  %v2196_v19 = vld [vmem:[#allocation10 + $0x38] sm:$0xff]  ;;  %v2193_v22 = vld [vmem:[#allocation10 + $0x20] sm:$0xff] }
  0xeb   : > { %v1011_v20 = vpop.f32.mrf.mxu1  ;;  %1419 = vmatpush.bf16.msrb.mxu0 %v2196_v19 }
  0xec   : > { %v1012_v23 = vadd.f32 %v1011_v20, %v998_v21  ;;  %v2195_v20 = vld [vmem:[#allocation10 + $0x30] sm:$0xff]  ;;  %v2194_v21 = vld [vmem:[#allocation10 + $0x28] sm:$0xff] }
  0xef   : > { %v1025_v18 = vpop.f32.mrf.mxu2  ;;  %1420 = vmatpush.bf16.msrb.mxu0 %v2195_v20 }
  0xf0   : > { %v1026_v28 = vadd.f32 %v1025_v18, %v1012_v23  ;;  %v1039_v30 = vpop.f32.mrf.mxu3  ;;  %v2192_v23 = vld [vmem:[#allocation10 + $0x18] sm:$0xff] }
  0xf2   : > { %v1040_v32 = vadd.f32 %v1039_v30, %v1026_v28 }
  0xf3   : > { %1421 = vmatpush.bf16.msrb.mxu0 %v2194_v21 }
  0xf7   : > { %v1079_v26 = vpop.f32.mrf.mxu2  ;;  %1422 = vmatpush.bf16.msrb.mxu0 %v2193_v22 }
  0xfb   : > { %1423 = vmatpush.bf16.msrb.mxu0 %v2192_v23 }
  0xff   : > { %v1081_v40 = vpop.f32.mrf.mxu2 }
 0x100   : > { %v1051_v24 = vpop.f32.mrf.mxu0 }
 0x101   : > { %v1052_v29 = vadd.f32 %v1051_v24, %v1038_v25  ;;  %v2191_v24 = vld [vmem:[#allocation10 + $0x10] sm:$0xff]  ;;  %v2190_v25 = vld [vmem:[#allocation10 + $0x8] sm:$0xff] }
 0x102   : > { %1424 = vmatpush.bf16.msrb.mxu0 %v2191_v24 }
 0x103   : > { %v1065_v27 = vpop.f32.mrf.mxu1 }
 0x104   : > { %v1066_v33 = vadd.f32 %v1065_v27, %v1052_v29  ;;  %v2301_v29 = vld [vmem:[%s2805_s4] ss:$0 sm:$0xff] }
 0x106   : > { %v1080_v39 = vadd.f32 %v1079_v26, %v1066_v33  ;;  %1425 = vmatpush.bf16.msrb.mxu0 %v2190_v25  ;;  %v2189_v26 = vld [vmem:[#allocation10] sm:$0xff] }
 0x108   : > { %v1053_v34 = vpop.f32.mrf.mxu0  ;;  %v1182_v45 = vmax.f32 %v1080_v39, 0.0  ;;  %v1093_v53 = vpop.f32.mrf.mxu3 }
 0x109   : > { %v1054_v35 = vadd.f32 %v1053_v34, %v1040_v32  ;;  %v1094_v1 = vadd.f32 %v1093_v53, %v489_v62 }
 0x10a   : > { %1426 = vmatpush.bf16.msrb.mxu0 %v2189_v26 }
 0x10b   : > { %v1067_v38 = vpop.f32.mrf.mxu1  ;;  %v1107_v50 = vpop.f32.mrf.mxu2 }
 0x10c   : > { %v1068_v41 = vadd.f32 %v1067_v38, %v1054_v35  ;;  %v1108_v6 = vadd.f32 %v1107_v50, %v1094_v1 }
 0x10e   : > { %v1082_v42 = vadd.f32 %v1081_v40, %v1068_v41  ;;  %v2302_v41 = vld [vmem:[%s2807_s6] ss:$0 sm:$0xff] }
 0x110   : > { %v1184_v46 = vmax.f32 %v1082_v42, 0.0  ;;  %v1095_v58 = vpop.f32.mrf.mxu3 }
 0x111   : > { %v1096_v3 = vadd.f32 %v1095_v58, %v489_v62 }
 0x112   : > { %v1186_v49 = vpack.c.bf16 %v1184_v46, %v1182_v45 }
 0x113   : > { %v1109_v56 = vpop.f32.mrf.mxu2 }
 0x114   : > { %1328 = vmatmul.bf16.vlgmr.msrb.gmra.mxu1 %v1186_v49  ;;  %v1110_v8 = vadd.f32 %v1109_v56, %v1096_v3 }
 0x120   : > { %v1121_v59 = vpop.f32.mrf.mxu0 }
 0x121   : > { %v1122_v9 = vadd.f32 %v1121_v59, %v1108_v6 }
 0x123   : > { %v1135_v0 = vpop.f32.mrf.mxu1 }
 0x124   : > { %v1136_v12 = vadd.f32 %v1135_v0, %v1122_v9 }
 0x128   : > { %v1149_v2 = vpop.f32.mrf.mxu3  ;;  %v1123_v7 = vpop.f32.mrf.mxu0 }
 0x129   : > { %v1124_v10 = vadd.f32 %v1123_v7, %v1110_v8  ;;  %v1150_v13 = vadd.f32 %v1149_v2, %v1136_v12 }
 0x12b   : > { %v1163_v61 = vpop.f32.mrf.mxu2  ;;  %v1137_v11 = vpop.f32.mrf.mxu1 }
 0x12c   : > { %v1138_v44 = vadd.f32 %v1137_v11, %v1124_v10  ;;  %v1164_v15 = vadd.f32 %v1163_v61, %v1150_v13 }
 0x130   : > { %v1151_v54 = vpop.f32.mrf.mxu3 }
 0x131   : > { %v1152_v14 = vadd.f32 %v1151_v54, %v1138_v44 }
 0x133   : > { %v1165_v5 = vpop.f32.mrf.mxu2 }
 0x134   : > { %v1166_v48 = vadd.f32 %v1165_v5, %v1152_v14 }
 0x13b   : > { %v1177_v37 = vpop.f32.mrf.mxu2 }
 0x13c   : > { %v1178_v63 = vadd.f32 %v1177_v37, %v1164_v15 }
 0x13e   : > { %v1183_v17 = vmax.f32 %v1178_v63, 0.0 }
 0x143   : > { %v1179_v4 = vpop.f32.mrf.mxu2 }
 0x144   : > { %v1180_v16 = vadd.f32 %v1179_v4, %v1166_v48 }
 0x146   : > { %v1185_v60 = vmax.f32 %v1180_v16, 0.0 }
 0x148   : > { %v1187_v18 = vpack.c.bf16 %v1185_v60, %v1183_v17 }
 0x14a   : > { %1342 = vmatmul.bf16.vlgmr.msrb.gmra.mxu3 %v1187_v18 }
 0x191   : > { %v1329_v27 = vpop.f32.mrf.mxu1 }
 0x192   : > { %v1330_v31 = vadd.f32 %v2301_v29, %v1329_v27 }
 0x199   : > { %v1331_v30 = vpop.f32.mrf.mxu1 }
 0x19a   : > { %v1332_v32 = vadd.f32 %v2301_v29, %v1331_v30 }
 0x1cd   : > { %v1343_v28 = vpop.f32.mrf.mxu3 }
 0x1ce   : > { %v1344_v33 = vadd.f32 %v1343_v28, %v1330_v31 }
 0x1d0   : > { %v1348_v36 = vmax.f32 %v1344_v33, 0.0 }
 0x1d5   : > { %v1345_v34 = vpop.f32.mrf.mxu3 }
 0x1d6   : > { %v1346_v35 = vadd.f32 %v1345_v34, %v1332_v32 }
 0x1d8   : > { %v1349_v38 = vmax.f32 %v1346_v35, 0.0 }
 0x1da   : > { %v1350_v39 = vpack.c.bf16 %v1349_v38, %v1348_v36 }
 0x1dc   : > { %1427 = vmatmul.bf16.vlgmr.msrb.gmra.mxu0 %v1350_v39 }
 0x259   : > { %v1428_v40 = vpop.f32.mrf.mxu0 }
 0x25a   : > { %v1429_v43 = vadd.f32 %v2302_v41, %v1428_v40 }
 0x261   : > { %v1430_v42 = vpop.f32.mrf.mxu0 }
 0x262   : > { %v1431_v45 = vadd.f32 %v2302_v41, %v1430_v42 }
 0x264   : > { %v2201_v46 = vpack.c.bf16 %v1431_v45, %v1429_v43 }
 0x266   : > { %2202 = vst [vmem:[%s363_s16] sm:$0xff] %v2201_v46  }
 0x267   : > { %2480 = shalt.err (!%p2477_p10)
}
 0x268   : > { %s2539_s2 = smov 64   ;;  %s2540_s19 = smov 4  }
 0x269   : > { %2224 = dma.vmem_to_hbm [thread:$0]  (%p2665_p3), %s1451_s23, 128, %s1453_s11, %s1438_s28, %s2539_s2, %s2539_s2, %s2540_s19  }
 0x26a PF: > { %s1467_s18 = sand.u32 1, %s2515_s24   ;;  %p2821_p12 = scmp.ge.s32.totalorder %s2527_s27, 2 }
 0x26b   : > { %s1468_s20 = scalar_lea.sflag [#allocation4], %s1467_s18 }
 0x26c   : > { %p2244_p13 = pnand %p2821_p12, %p2616_p6 }
 0x26e   : > { %p2245_p0 = pneg %p2244_p13 }
 0x270   : > { %2510 = dma.done.wait (%p2245_p0), %s1468_s20, 128  }
 0x271   : > { %2512 = vsyncadd (%p2245_p0), %s1468_s20, 4294967168  ;;  %p22_p5 = scmp.ge.s32.totalorder %s2655_s21, 4   ;;  %s2822_s24 = smov %s2519_s25 }
 0x272   : > { %s2823_s25 = smov %s2523_s26  ;;  %s2824_s26 = smov %s2671_s13 }
 0x273   : > { %s2825_s27 = smov %s2655_s21  ;;  %24 = sbr.rel (!%p22_p5) target bundleno = 11 (0xb), region = 109 }
 0x278   :  { %1474 = vsyncpa [#allocation3], 1 }
 0x279   :  { %1476 = vsyncpa [#allocation3 + $0x1], 1 }
 0x27a   :  { %1477 = vsyncpa [#allocation6], 1 }
 0x27b   :  { %1478 = vsyncpa [#allocation9], 1 }
 0x27c   :  { %1479 = vsyncpa [#allocation4], 1 }
 0x27d   :  { %1481 = vsyncpa [#allocation4 + $0x1], 1 }

</bundles_post_ra>
